<compile_context>
chip_gen: v7x
topology: tpu7x:2x2x1
jax: 0.10.0
libtpu: 0.0.40
codegen_flags: <defaults>
</compile_context>

<pallas_src>
import math

import jax
import jax.numpy as jnp
from jax.experimental import pallas as pl
from jax.experimental.pallas import tpu as pltpu

LANE = 128  # TPU lane width


# ----------------------------------------------------------------------------
# Pallas kernels.
# ----------------------------------------------------------------------------
def _fused_gnn_kernel(a_ref, xw1_ref, b1_ref, w2_ref, b2_ref, wfc_ref,
                      out_ref, h1_scr):
    """Small-N fast path: both GCN layers + FC head in one kernel (grid=(1,))."""
    # Layer 1: h1 = relu(A @ (X W1) + b1)   (X W1 precomputed in the wrapper)
    ax = jnp.dot(a_ref[...], xw1_ref[...],
                 preferred_element_type=jnp.float32)            # [N, Hp] f32
    h1 = jnp.maximum(ax + b1_ref[...], 0.0)
    h1_scr[...] = h1.astype(jnp.bfloat16)                       # stays in VMEM
    # Layer 2: h2 = relu((A @ h1) @ W2 + b2)
    ah = jnp.dot(a_ref[...], h1_scr[...],
                 preferred_element_type=jnp.float32)            # [N, Hp] f32
    h2 = jnp.dot(ah.astype(jnp.bfloat16), w2_ref[...],
                 preferred_element_type=jnp.float32)            # [N, Cp] f32
    h2 = jnp.maximum(h2 + b2_ref[...], 0.0)
    # FC head (scalar bias folded into the wrapper), lane-dense bf16 slab.
    out = jnp.dot(h2.astype(jnp.bfloat16), wfc_ref[...],
                  preferred_element_type=jnp.float32)           # [N, 128] f32
    out_ref[...] = out.astype(out_ref.dtype)


def _gcn_layer1_kernel(a_ref, xw1_ref, b1_ref, h1_ref, acc_ref):
    """Large-N pass 1: h1 = relu(A @ XW1 + b1), K-tiled over the node axis."""
    k = pl.program_id(1)

    @pl.when(k == 0)
    def _init():
        acc_ref[...] = jnp.zeros_like(acc_ref)

    acc_ref[...] += jnp.dot(a_ref[...], xw1_ref[...],
                            preferred_element_type=jnp.float32)

    @pl.when(k == pl.num_programs(1) - 1)
    def _finalize():
        h1_ref[...] = jnp.maximum(acc_ref[...] + b1_ref[...],
                                  0.0).astype(h1_ref.dtype)


def _gcn_layer2_kernel(a_ref, h1_ref, b2_ref, w2_ref, wfc_ref, out_ref,
                       acc_ref):
    """Large-N pass 2: relu((A @ h1) @ W2 + b2) @ Wfc, K-tiled over nodes."""
    k = pl.program_id(1)

    @pl.when(k == 0)
    def _init():
        acc_ref[...] = jnp.zeros_like(acc_ref)

    acc_ref[...] += jnp.dot(a_ref[...], h1_ref[...],
                            preferred_element_type=jnp.float32)

    @pl.when(k == pl.num_programs(1) - 1)
    def _finalize():
        h2 = jnp.dot(acc_ref[...].astype(jnp.bfloat16), w2_ref[...],
                     preferred_element_type=jnp.float32)
        h2 = jnp.maximum(h2 + b2_ref[...], 0.0)
        out = jnp.dot(h2.astype(jnp.bfloat16), wfc_ref[...],
                      preferred_element_type=jnp.float32)
        out_ref[...] = out.astype(out_ref.dtype)


# ----------------------------------------------------------------------------
# Wrapper: padding, bf16 casts, fused fast path or two K-tiled pallas_calls.
# ----------------------------------------------------------------------------
def _round_up(x, m):
    return ((x + m - 1) // m) * m


def _pad2(arr, shape):
    return jnp.pad(arr, [(0, s - d) for d, s in zip(arr.shape, shape)])


def traffic_anomaly_gnn_forward(a_hat, x, params, *, tm=256, tk=512,
                                force_two_pass=False):
    """Forward pass.  a_hat: [N,N] f32 normalized adjacency, x: [N,Fin] f32."""
    assert tm % 16 == 0, "tm must be a multiple of 16 (bf16 sublane packing)"
    assert tk % LANE == 0, "tk must be a multiple of 128 (lane width)"

    n, _ = x.shape
    hidden = params["w1"].shape[1]
    out_c = params["w2"].shape[1]

    h_pad = _round_up(hidden, LANE)
    c_pad = _round_up(out_c, LANE)

    # Hoisted out of the kernels: tiny f32 [N,Fin] x [Fin,H] matmul.
    xw1 = x @ params["w1"]

    b1_p = _pad2(params["b1"].reshape(1, -1), (1, h_pad)).astype(jnp.float32)
    w2_p = _pad2(params["w2"], (h_pad, c_pad)).astype(jnp.bfloat16)
    b2_p = _pad2(params["b2"].reshape(1, -1), (1, c_pad)).astype(jnp.float32)
    wfc_p = _pad2(params["wfc"], (c_pad, LANE)).astype(jnp.bfloat16)

    # ---------- small-N fused fast path ----------
    n_pad_small = _round_up(n, LANE)
    fast_bytes = (2 * (n_pad_small * n_pad_small * 2        # A (bf16, dbl buf)
                       + n_pad_small * h_pad * 2            # XW1
                       + h_pad * c_pad * 2                  # W2
                       + c_pad * LANE * 2                   # Wfc
                       + (h_pad + c_pad) * 4                # biases
                       + n_pad_small * LANE * 2)            # output slab
                  + n_pad_small * h_pad * 2)                # h1 VMEM scratch
    use_fused = (not force_two_pass) and fast_bytes <= 10 * 1024 * 1024

    vmem_limit = 48 * 1024 * 1024

    if use_fused:
        n_pad = n_pad_small
        a_p = _pad2(a_hat, (n_pad, n_pad)).astype(jnp.bfloat16)
        xw1_p = _pad2(xw1, (n_pad, h_pad)).astype(jnp.bfloat16)

        full = lambda arr: pl.BlockSpec(arr.shape, lambda i: (0, 0))
        slab = pl.pallas_call(
            _fused_gnn_kernel,
            out_shape=jax.ShapeDtypeStruct((n_pad, LANE), jnp.bfloat16),
            grid_spec=pltpu.PrefetchScalarGridSpec(
                num_scalar_prefetch=0,
                grid=(1,),
                in_specs=[full(a_p), full(xw1_p), full(b1_p), full(w2_p),
                          full(b2_p), full(wfc_p)],
                out_specs=pl.BlockSpec((n_pad, LANE), lambda i: (0, 0)),
                scratch_shapes=[pltpu.VMEM((n_pad, h_pad), jnp.bfloat16)],
            ),
            compiler_params=pltpu.CompilerParams(
                dimension_semantics=("arbitrary",),
                vmem_limit_bytes=vmem_limit),
        )(a_p, xw1_p, b1_p, w2_p, b2_p, wfc_p)
    else:
        # ---------- large-N, K-tiled two-pass path ----------
        n_pad = _round_up(n, math.lcm(tm, tk))
        a_p = _pad2(a_hat, (n_pad, n_pad)).astype(jnp.bfloat16)
        xw1_p = _pad2(xw1, (n_pad, h_pad)).astype(jnp.bfloat16)

        grid = (n_pad // tm, n_pad // tk)
        cparams = pltpu.CompilerParams(
            dimension_semantics=("parallel", "arbitrary"),
            vmem_limit_bytes=vmem_limit)

        a_spec = pl.BlockSpec((tm, tk), lambda i, k: (i, k))
        kfeat_spec = lambda w: pl.BlockSpec((tk, w), lambda i, k: (k, 0))
        const_spec = lambda arr: pl.BlockSpec(arr.shape, lambda i, k: (0, 0))
        rowout_spec = lambda w: pl.BlockSpec((tm, w), lambda i, k: (i, 0))

        # Pass 1: h1 = relu(A @ XW1 + b1) for all nodes (complete before L2).
        h1 = pl.pallas_call(
            _gcn_layer1_kernel,
            out_shape=jax.ShapeDtypeStruct((n_pad, h_pad), jnp.bfloat16),
            grid_spec=pltpu.PrefetchScalarGridSpec(
                num_scalar_prefetch=0,
                grid=grid,
                in_specs=[a_spec, kfeat_spec(h_pad), const_spec(b1_p)],
                out_specs=rowout_spec(h_pad),
                scratch_shapes=[pltpu.VMEM((tm, h_pad), jnp.float32)],
            ),
            compiler_params=cparams,
        )(a_p, xw1_p, b1_p)

        # Pass 2: relu((A @ h1) @ W2 + b2) @ Wfc (separate call: every row
        # tile needs the *complete* h1).
        slab = pl.pallas_call(
            _gcn_layer2_kernel,
            out_shape=jax.ShapeDtypeStruct((n_pad, LANE), jnp.bfloat16),
            grid_spec=pltpu.PrefetchScalarGridSpec(
                num_scalar_prefetch=0,
                grid=grid,
                in_specs=[a_spec, kfeat_spec(h_pad), const_spec(b2_p),
                          const_spec(w2_p), const_spec(wfc_p)],
                out_specs=rowout_spec(LANE),
                scratch_shapes=[pltpu.VMEM((tm, h_pad), jnp.float32)],
            ),
            compiler_params=cparams,
        )(a_p, h1, b2_p, w2_p, wfc_p)

    # Slice the real rows / column 0; fold the scalar fc bias in f32 here.
    return slab[:n, :1].astype(jnp.float32) + params["bfc"].reshape(1, 1)


# ----------------------------------------------------------------------------
# Glue: dense normalized adjacency D^{-1/2}(A+I)D^{-1/2} from edge_index.
# ----------------------------------------------------------------------------
def build_normalized_adjacency(edge_index, num_nodes):
    src, dst = edge_index[0], edge_index[1]
    adj = jnp.zeros((num_nodes, num_nodes), jnp.float32)
    adj = adj.at[dst, src].add(1.0)                 # message j -> i
    adj = adj + jnp.eye(num_nodes, dtype=jnp.float32)
    deg = jnp.sum(adj, axis=1)
    dinv = jnp.where(deg > 0, 1.0 / jnp.sqrt(deg), 0.0)
    return dinv[:, None] * adj * dinv[None, :]


# ----------------------------------------------------------------------------
# Deterministic parameter init (shapes from __init__); nonzero biases so the
# bias path is actually exercised.
# ----------------------------------------------------------------------------
def init_params(key, in_channels, hidden_channels, out_channels):
    k1, k2, k3, k4, k5, k6 = jax.random.split(key, 6)
    scale = lambda fan_in: 1.0 / jnp.sqrt(jnp.float32(fan_in))
    return {
        "w1": jax.random.normal(k1, (in_channels, hidden_channels),
                                jnp.float32) * scale(in_channels),
        "b1": jax.random.normal(k4, (1, hidden_channels), jnp.float32) * 0.1,
        "w2": jax.random.normal(k2, (hidden_channels, out_channels),
                                jnp.float32) * scale(hidden_channels),
        "b2": jax.random.normal(k5, (1, out_channels), jnp.float32) * 0.1,
        "wfc": jax.random.normal(k3, (out_channels, 1),
                                 jnp.float32) * scale(out_channels),
        "bfc": jax.random.normal(k6, (1, 1), jnp.float32) * 0.1,
    }


# ----------------------------------------------------------------------------
# References: pure-f32 module semantics, and a bf16-cast mimic of the kernel.
# ----------------------------------------------------------------------------
def reference_forward(a_hat, x, p):
    h1 = jnp.maximum(a_hat @ (x @ p["w1"]) + p["b1"], 0.0)
    h2 = jnp.maximum(a_hat @ (h1 @ p["w2"]) + p["b2"], 0.0)
    return h2 @ p["wfc"] + p["bfc"]


def reference_forward_bf16(a_hat, x, p):
    bf = lambda t: t.astype(jnp.bfloat16)
    f32 = jnp.float32
    xw1 = x @ p["w1"]                                       # hoisted, f32
    h1 = jnp.maximum(
        jnp.dot(bf(a_hat), bf(xw1), preferred_element_type=f32) + p["b1"], 0.0)
    ah = jnp.dot(bf(a_hat), bf(h1), preferred_element_type=f32)
    h2 = jnp.maximum(
        jnp.dot(bf(ah), bf(p["w2"]), preferred_element_type=f32) + p["b2"], 0.0)
    out = jnp.dot(bf(h2), bf(p["wfc"]), preferred_element_type=f32)
    return out.astype(jnp.bfloat16).astype(f32) + p["bfc"]   # bf16 slab store


if __name__ == "__main__":
    key = jax.random.PRNGKey(0)
    kx, kp, kx2 = jax.random.split(key, 3)

    in_channels, hidden_channels, out_channels = 8, 32, 16
    params = init_params(kp, in_channels, hidden_channels, out_channels)

    def ring_graph(num_nodes):
        idx = jnp.arange(num_nodes, dtype=jnp.int32)
        nxt = (idx + 1) % num_nodes
        return jnp.stack([jnp.concatenate([idx, nxt]),
                          jnp.concatenate([nxt, idx])], axis=0)

    # --- Case 1: small graph (96 nodes) -> fused single-kernel fast path. ---
    n1 = 96
    x1 = jax.random.normal(kx, (n1, in_channels), jnp.float32)
    a1 = build_normalized_adjacency(ring_graph(n1), n1)
    out1 = jax.block_until_ready(traffic_anomaly_gnn_forward(a1, x1, params))
    assert out1.shape == (n1, 1)
    ref1_bf = reference_forward_bf16(a1, x1, params)
    ref1_32 = reference_forward(a1, x1, params)
    assert jnp.allclose(out1, ref1_bf, atol=2e-2, rtol=2e-2), \
        float(jnp.max(jnp.abs(out1 - ref1_bf)))
    assert jnp.allclose(out1, ref1_32, atol=1e-1, rtol=1e-1), \
        float(jnp.max(jnp.abs(out1 - ref1_32)))

    # --- Case 2: larger graph, force the K-tiled two-pass path. ---
    n2 = 300
    x2 = jax.random.normal(kx2, (n2, in_channels), jnp.float32)
    a2 = build_normalized_adjacency(ring_graph(n2), n2)
    out2 = jax.block_until_ready(
        traffic_anomaly_gnn_forward(a2, x2, params, tm=128, tk=128,
                                    force_two_pass=True))
    assert out2.shape == (n2, 1)
    ref2_bf = reference_forward_bf16(a2, x2, params)
    ref2_32 = reference_forward(a2, x2, params)
    assert jnp.allclose(out2, ref2_bf, atol=2e-2, rtol=2e-2), \
        float(jnp.max(jnp.abs(out2 - ref2_bf)))
    assert jnp.allclose(out2, ref2_32, atol=1e-1, rtol=1e-1), \
        float(jnp.max(jnp.abs(out2 - ref2_32)))

    print("KERNEL_OK")
</pallas_src>

<mosaic_0001>
module attributes {stable_mosaic.version = 11 : i64} {
  func.func @_fused_gnn_kernel(%arg0: i32, %arg1: memref<128x128xbf16, #tpu.memory_space<vmem>>, %arg2: memref<128x128xbf16, #tpu.memory_space<vmem>>, %arg3: memref<1x128xf32, #tpu.memory_space<vmem>>, %arg4: memref<128x128xbf16, #tpu.memory_space<vmem>>, %arg5: memref<1x128xf32, #tpu.memory_space<vmem>>, %arg6: memref<128x128xbf16, #tpu.memory_space<vmem>>, %arg7: memref<128x128xbf16, #tpu.memory_space<vmem>>, %arg8: memref<128x128xbf16, #tpu.memory_space<vmem>>) attributes {dimension_semantics = [#tpu.dimension_semantics<arbitrary>], iteration_bounds = array<i64: 1>, scalar_prefetch = 0 : i64, scratch_operands = 1 : i64, tpu.core_type = #tpu.core_type<tc>, window_params = [{pipeline_mode = #tpu.pipeline_mode<synchronous>, transform_indices = @transform_0, window_bounds = array<i64: 128, 128>}, {pipeline_mode = #tpu.pipeline_mode<synchronous>, transform_indices = @transform_1, window_bounds = array<i64: 128, 128>}, {pipeline_mode = #tpu.pipeline_mode<synchronous>, transform_indices = @transform_2, window_bounds = array<i64: 1, 128>}, {pipeline_mode = #tpu.pipeline_mode<synchronous>, transform_indices = @transform_3, window_bounds = array<i64: 128, 128>}, {pipeline_mode = #tpu.pipeline_mode<synchronous>, transform_indices = @transform_4, window_bounds = array<i64: 1, 128>}, {pipeline_mode = #tpu.pipeline_mode<synchronous>, transform_indices = @transform_5, window_bounds = array<i64: 128, 128>}, {pipeline_mode = #tpu.pipeline_mode<synchronous>, transform_indices = @transform_6, window_bounds = array<i64: 128, 128>}]} {
    %c0 = arith.constant 0 : index
    %c0_0 = arith.constant 0 : index
    %0 = vector.load %arg1[%c0, %c0_0] : memref<128x128xbf16, #tpu.memory_space<vmem>>, vector<128x128xbf16>
    %c0_1 = arith.constant 0 : index
    %c0_2 = arith.constant 0 : index
    %1 = vector.load %arg2[%c0_1, %c0_2] : memref<128x128xbf16, #tpu.memory_space<vmem>>, vector<128x128xbf16>
    %cst = arith.constant dense<0.000000e+00> : vector<128x128xf32>
    %2 = tpu.matmul %0, %1, %cst {dimension_numbers = #tpu.dot_dimension_numbers<[1], [0], [0], [1], [0, 0, 1, 1], [], []>} : vector<128x128xbf16>, vector<128x128xbf16>, vector<128x128xf32> -> vector<128x128xf32>
    %c0_3 = arith.constant 0 : index
    %c0_4 = arith.constant 0 : index
    %3 = vector.load %arg3[%c0_3, %c0_4] : memref<1x128xf32, #tpu.memory_space<vmem>>, vector<1x128xf32>
    %4 = vector.broadcast %3 : vector<1x128xf32> to vector<128x128xf32>
    %5 = arith.addf %2, %4 : vector<128x128xf32>
    %cst_5 = arith.constant 0.000000e+00 : f32
    %6 = vector.broadcast %cst_5 : f32 to vector<128x128xf32>
    %7 = arith.maximumf %5, %6 : vector<128x128xf32>
    %8 = arith.truncf %7 : vector<128x128xf32> to vector<128x128xbf16>
    %c0_6 = arith.constant 0 : index
    %c0_7 = arith.constant 0 : index
    %9 = vector.load %arg8[%c0_6, %c0_7] : memref<128x128xbf16, #tpu.memory_space<vmem>>, vector<128x128xbf16>
    tpu.vector_store %arg8[%c0_6, %c0_7], %8 {strides = array<i32>} : memref<128x128xbf16, #tpu.memory_space<vmem>>, vector<128x128xbf16>,
    %c0_8 = arith.constant 0 : index
    %c0_9 = arith.constant 0 : index
    %10 = vector.load %arg1[%c0_8, %c0_9] : memref<128x128xbf16, #tpu.memory_space<vmem>>, vector<128x128xbf16>
    %c0_10 = arith.constant 0 : index
    %c0_11 = arith.constant 0 : index
    %11 = vector.load %arg8[%c0_10, %c0_11] : memref<128x128xbf16, #tpu.memory_space<vmem>>, vector<128x128xbf16>
    %cst_12 = arith.constant dense<0.000000e+00> : vector<128x128xf32>
    %12 = tpu.matmul %10, %11, %cst_12 {dimension_numbers = #tpu.dot_dimension_numbers<[1], [0], [0], [1], [0, 0, 1, 1], [], []>} : vector<128x128xbf16>, vector<128x128xbf16>, vector<128x128xf32> -> vector<128x128xf32>
    %13 = arith.truncf %12 : vector<128x128xf32> to vector<128x128xbf16>
    %c0_13 = arith.constant 0 : index
    %c0_14 = arith.constant 0 : index
    %14 = vector.load %arg4[%c0_13, %c0_14] : memref<128x128xbf16, #tpu.memory_space<vmem>>, vector<128x128xbf16>
    %cst_15 = arith.constant dense<0.000000e+00> : vector<128x128xf32>
    %15 = tpu.matmul %13, %14, %cst_15 {dimension_numbers = #tpu.dot_dimension_numbers<[1], [0], [0], [1], [0, 0, 1, 1], [], []>} : vector<128x128xbf16>, vector<128x128xbf16>, vector<128x128xf32> -> vector<128x128xf32>
    %c0_16 = arith.constant 0 : index
    %c0_17 = arith.constant 0 : index
    %16 = vector.load %arg5[%c0_16, %c0_17] : memref<1x128xf32, #tpu.memory_space<vmem>>, vector<1x128xf32>
    %17 = vector.broadcast %16 : vector<1x128xf32> to vector<128x128xf32>
    %18 = arith.addf %15, %17 : vector<128x128xf32>
    %cst_18 = arith.constant 0.000000e+00 : f32
    %19 = vector.broadcast %cst_18 : f32 to vector<128x128xf32>
    %20 = arith.maximumf %18, %19 : vector<128x128xf32>
    %21 = arith.truncf %20 : vector<128x128xf32> to vector<128x128xbf16>
    %c0_19 = arith.constant 0 : index
    %c0_20 = arith.constant 0 : index
    %22 = vector.load %arg6[%c0_19, %c0_20] : memref<128x128xbf16, #tpu.memory_space<vmem>>, vector<128x128xbf16>
    %cst_21 = arith.constant dense<0.000000e+00> : vector<128x128xf32>
    %23 = tpu.matmul %21, %22, %cst_21 {dimension_numbers = #tpu.dot_dimension_numbers<[1], [0], [0], [1], [0, 0, 1, 1], [], []>} : vector<128x128xbf16>, vector<128x128xbf16>, vector<128x128xf32> -> vector<128x128xf32>
    %24 = arith.truncf %23 : vector<128x128xf32> to vector<128x128xbf16>
    %c0_22 = arith.constant 0 : index
    %c0_23 = arith.constant 0 : index
    %25 = vector.load %arg7[%c0_22, %c0_23] : memref<128x128xbf16, #tpu.memory_space<vmem>>, vector<128x128xbf16>
    tpu.vector_store %arg7[%c0_22, %c0_23], %24 {strides = array<i32>} : memref<128x128xbf16, #tpu.memory_space<vmem>>, vector<128x128xbf16>,
    return
  }
  func.func @transform_0(%arg0: i32) -> (i32, i32) {
    %c0_i32 = arith.constant 0 : i32
    %c0_i32_0 = arith.constant 0 : i32
    %c0_i32_1 = arith.constant 0 : i32
    return %c0_i32, %c0_i32_0 : i32, i32
  }
  func.func @transform_1(%arg0: i32) -> (i32, i32) {
    %c0_i32 = arith.constant 0 : i32
    %c0_i32_0 = arith.constant 0 : i32
    %c0_i32_1 = arith.constant 0 : i32
    return %c0_i32, %c0_i32_0 : i32, i32
  }
  func.func @transform_2(%arg0: i32) -> (i32, i32) {
    %c0_i32 = arith.constant 0 : i32
    %c0_i32_0 = arith.constant 0 : i32
    %c0_i32_1 = arith.constant 0 : i32
    return %c0_i32, %c0_i32_0 : i32, i32
  }
  func.func @transform_3(%arg0: i32) -> (i32, i32) {
    %c0_i32 = arith.constant 0 : i32
    %c0_i32_0 = arith.constant 0 : i32
    %c0_i32_1 = arith.constant 0 : i32
    return %c0_i32, %c0_i32_0 : i32, i32
  }
  func.func @transform_4(%arg0: i32) -> (i32, i32) {
    %c0_i32 = arith.constant 0 : i32
    %c0_i32_0 = arith.constant 0 : i32
    %c0_i32_1 = arith.constant 0 : i32
    return %c0_i32, %c0_i32_0 : i32, i32
  }
  func.func @transform_5(%arg0: i32) -> (i32, i32) {
    %c0_i32 = arith.constant 0 : i32
    %c0_i32_0 = arith.constant 0 : i32
    %c0_i32_1 = arith.constant 0 : i32
    return %c0_i32, %c0_i32_0 : i32, i32
  }
  func.func @transform_6(%arg0: i32) -> (i32, i32) {
    %c0_i32 = arith.constant 0 : i32
    %c0_i32_0 = arith.constant 0 : i32
    %c0_i32_1 = arith.constant 0 : i32
    return %c0_i32, %c0_i32_0 : i32, i32
  }
}

</mosaic_0001>

<bundles_post_ra>
// kernel: tpu_custom_call.1
= control target key start
LH: loop header
LB: loop body
LE: loop exit
PB: predicated region body
PF: predicated region fallthrough
CT: control target
= control target key end

     0   :  { %11 = vsyncpa [#allocation4], 0  ;;  %s1588_s0 = inlined_call_operand.hbm [shape: bf16[128,128], index: 0, kind: input, shape index: {}]   ;;  %s1589_s1 = inlined_call_operand.hbm [shape: bf16[128,128], index: 1, kind: input, shape index: {}]   ;;  %s1590_s2 = inlined_call_operand.vmem [shape: f32[1,128], index: 2, kind: input, shape index: {}]   ;;  %s1591_s3 = inlined_call_operand.hbm [shape: bf16[128,128], index: 3, kind: input, shape index: {}]   ;;  %s1592_s4 = inlined_call_operand.vmem [shape: f32[1,128], index: 4, kind: input, shape index: {}]   ;;  %s1593_s5 = inlined_call_operand.hbm [shape: bf16[128,128], index: 5, kind: input, shape index: {}]   ;;  %s1594_s6 = inlined_call_operand.hbm [shape: bf16[128,128], index: 6, kind: output, shape index: {}]  }
   0x1   :  { %12 = vsyncpa [#allocation7], 0 }
   0x2   :  { %13 = vsyncpa [#allocation10], 0 }
   0x3   :  { %14 = vsyncpa [#allocation5], 0  ;;  %s1451_s21 = smov [#allocation6]   ;;  %s1452_s23 = smov [#allocation3]  }
   0x4   :  { %s32_s22 = sshll.u32 %s1451_s21, 4  ;;  %s20_s24 = sshll.u32 %s1452_s23, 4  ;;  %s33_s22 = int_to_ptr.vmem [resolvable:$true] %s32_s22  ;;  %s1493_s24 = int_to_ptr.vmem [resolvable:$true] %s20_s24 }
   0x5   :  { %s1333_s27 = scalar_lea.hbm %s1589_s1, 1024 }
   0x6   :  { %p1334_p0 = scmp.ne.s32.totalorder %s1589_s1, %s1333_s27  ;;  %p1337_p1 = scmp.lt.u32.totalorder %s1333_s27, %s1589_s1 }
   0x8   :  { %p1339_p2 = pnand %p1337_p1, %p1334_p0 }
   0xa   :  { %1342 = shalt.err (!%p1339_p2)
}
   0xb   :  { %s1343_s8 = scalar_lea.vmem %s33_s22, 1024  ;;  %p1348_p4 = scmp.lt.s32.totalorder %s33_s22, %s33_s22 }
   0xc   :  { %p1344_p3 = scmp.ne.s32.totalorder %s33_s22, %s1343_s8  ;;  %p1349_p5 = scmp.lt.s32.totalorder %s1343_s8, %s1343_s8 }
   0xe   :  { %p1350_p6 = por %p1349_p5, %p1348_p4 }
  0x10   :  { %p1351_p7 = pnand %p1350_p6, %p1344_p3 }
  0x12   :  { %1354 = shalt.err (!%p1351_p7)
}
  0x13   :  { %s1453_s9 = smov 64   ;;  %s1454_s10 = smov 4  }
  0x14   :  { %38 = dma.hbm_to_vmem [thread:$0]  %s1589_s1, 1024, %s33_s22, [#allocation7], %s1453_s9, %s1453_s9, %s1454_s10  }
  0x15   :  { %s1355_s15 = scalar_lea.hbm %s1588_s0, 1024 }
  0x16   :  { %p1356_p8 = scmp.ne.s32.totalorder %s1588_s0, %s1355_s15  ;;  %p1359_p9 = scmp.lt.u32.totalorder %s1355_s15, %s1588_s0 }
  0x18   :  { %p1361_p10 = pnand %p1359_p9, %p1356_p8 }
  0x1a   :  { %1364 = shalt.err (!%p1361_p10)
}
  0x1b   :  { %s1365_s20 = scalar_lea.vmem %s1493_s24, 1024  ;;  %p1370_p12 = scmp.lt.s32.totalorder %s1493_s24, %s1493_s24 }
  0x1c   :  { %p1366_p11 = scmp.ne.s32.totalorder %s1493_s24, %s1365_s20  ;;  %p1371_p13 = scmp.lt.s32.totalorder %s1365_s20, %s1365_s20 }
  0x1e   :  { %p1372_p0 = por %p1371_p13, %p1370_p12 }
  0x20   :  { %p1373_p1 = pnand %p1372_p0, %p1366_p11 }
  0x22   :  { %1376 = shalt.err (!%p1373_p1)
}
  0x23   :  { %26 = dma.hbm_to_vmem [thread:$0]  %s1588_s0, 1024, %s1493_s24, [#allocation4], %s1453_s9, %s1453_s9, %s1454_s10  }
  0x24   :  { %s1455_s22 = smov [#allocation8]   ;;  %s1456_s25 = smov [#allocation9]  }
  0x25   :  { %s46_s23 = sshll.u32 %s1455_s22, 4  ;;  %s60_s26 = sshll.u32 %s1456_s25, 4  ;;  %s47_s23 = int_to_ptr.vmem [resolvable:$true] %s46_s23  ;;  %s1530_s26 = int_to_ptr.vmem [resolvable:$true] %s60_s26 }
  0x26   :  { %s1377_s29 = scalar_lea.hbm %s1591_s3, 1024 }
  0x27   :  { %p1378_p2 = scmp.ne.s32.totalorder %s1591_s3, %s1377_s29  ;;  %p1381_p3 = scmp.lt.u32.totalorder %s1377_s29, %s1591_s3 }
  0x29   :  { %p1383_p4 = pnand %p1381_p3, %p1378_p2 }
  0x2b   :  { %1386 = shalt.err (!%p1383_p4)
}
  0x2c   :  { %s1387_s0 = scalar_lea.vmem %s47_s23, 1024  ;;  %p1392_p6 = scmp.lt.s32.totalorder %s47_s23, %s47_s23 }
  0x2d   :  { %p1388_p5 = scmp.ne.s32.totalorder %s47_s23, %s1387_s0  ;;  %p1393_p7 = scmp.lt.s32.totalorder %s1387_s0, %s1387_s0 }
  0x2f   :  { %p1394_p8 = por %p1393_p7, %p1392_p6 }
  0x31   :  { %p1395_p9 = pnand %p1394_p8, %p1388_p5 }
  0x33   :  { %1398 = shalt.err (!%p1395_p9)
}
  0x34   :  { %52 = dma.hbm_to_vmem [thread:$0]  %s1591_s3, 1024, %s47_s23, [#allocation7], %s1453_s9, %s1453_s9, %s1454_s10  }
  0x35   :  { %s1399_s15 = scalar_lea.hbm %s1593_s5, 1024 }
  0x36   :  { %p1400_p10 = scmp.ne.s32.totalorder %s1593_s5, %s1399_s15  ;;  %p1403_p11 = scmp.lt.u32.totalorder %s1399_s15, %s1593_s5 }
  0x38   :  { %p1405_p12 = pnand %p1403_p11, %p1400_p10 }
  0x3a   :  { %1408 = shalt.err (!%p1405_p12)
}
  0x3b   :  { %s1409_s20 = scalar_lea.vmem %s1530_s26, 1024  ;;  %p1414_p0 = scmp.lt.s32.totalorder %s1530_s26, %s1530_s26 }
  0x3c   :  { %p1410_p13 = scmp.ne.s32.totalorder %s1530_s26, %s1409_s20  ;;  %p1415_p1 = scmp.lt.s32.totalorder %s1409_s20, %s1409_s20 }
  0x3e   :  { %p1416_p2 = por %p1415_p1, %p1414_p0 }
  0x40   :  { %p1417_p3 = pnand %p1416_p2, %p1410_p13 }
  0x42   :  { %1420 = shalt.err (!%p1417_p3)
}
  0x43   :  { %66 = dma.hbm_to_vmem [thread:$0]  %s1593_s5, 1024, %s1530_s26, [#allocation10], %s1453_s9, %s1453_s9, %s1454_s10  }
  0x44   :  { %1443 = dma.done.wait [#allocation4], 1024  }
  0x45   :  { %1444 = vsyncadd [#allocation4], 4294966272 }
  0x46   :  { %1445 = dma.done.wait [#allocation7], 2048  }
  0x47   :  { %1446 = vsyncadd [#allocation7], 4294965248 }
  0x48   :  { %1447 = dma.done.wait [#allocation10], 1024  }
  0x49   :  { %1448 = vsyncadd [#allocation10], 4294966272  ;;  %v1293_v0 = vld [vmem:[#allocation6] sm:$0xff]   ;;  %v1294_v1 = vld [vmem:[#allocation6 + $0x8] sm:$0xff]  }
  0x4a   :  { %1158 = vmatprep.subr.bf16.mxu0 %v1293_v0  ;;  %v1295_v2 = vld [vmem:[#allocation6 + $0x10] sm:$0xff]   ;;  %v1296_v3 = vld [vmem:[#allocation6 + $0x18] sm:$0xff]   ;;  %v1301_v4 = vld [vmem:[#allocation3] sm:$0xff]  }
  0x4b   :  { %1159 = vmatpush3.bf16.msra.mxu0 %v1293_v0  ;;  %1174 = vmatprep.mubr.bf16.mxu0 %v1301_v4  ;;  %v1297_v5 = vld [vmem:[#allocation6 + $0x20] sm:$0xff]   ;;  %v1298_v6 = vld [vmem:[#allocation6 + $0x28] sm:$0xff]   ;;  %v1299_v7 = vld [vmem:[#allocation6 + $0x30] sm:$0xff]  }
  0x4c   :  { %1160 = vmatprep.subr.bf16.mxu0 %v1294_v1  ;;  %v1300_v8 = vld [vmem:[#allocation6 + $0x38] sm:$0xff]   ;;  %v1302_v9 = vld [vmem:[#allocation3 + $0x8] sm:$0xff]   ;;  %v1303_v10 = vld [vmem:[#allocation3 + $0x10] sm:$0xff]  }
  0x4d   :  { %v1304_v11 = vld [vmem:[#allocation3 + $0x18] sm:$0xff]   ;;  %v1305_v12 = vld [vmem:[#allocation3 + $0x20] sm:$0xff]   ;;  %v1306_v13 = vld [vmem:[#allocation3 + $0x28] sm:$0xff]  }
  0x4e   :  { %v1307_v14 = vld [vmem:[#allocation3 + $0x30] sm:$0xff]   ;;  %v1308_v15 = vld [vmem:[#allocation3 + $0x38] sm:$0xff]   ;;  %v1309_v16 = vld [vmem:[#allocation3] sm:$0xff]  }
  0x4f   :  { %1161 = vmatpush3.bf16.msra.mxu0 %v1294_v1  ;;  %1206 = vmatprep.mubr.bf16.mxu1 %v1309_v16  ;;  %v1317_v17 = vld [vmem:[#allocation8] sm:$0xff]   ;;  %v1318_v18 = vld [vmem:[#allocation8 + $0x8] sm:$0xff]   ;;  %v1319_v19 = vld [vmem:[#allocation8 + $0x10] sm:$0xff]  }
  0x50   :  { %1162 = vmatprep.subr.bf16.mxu0 %v1295_v2  ;;  %v1320_v20 = vld [vmem:[#allocation8 + $0x18] sm:$0xff]   ;;  %v1321_v21 = vld [vmem:[#allocation8 + $0x20] sm:$0xff]   ;;  %v1322_v22 = vld [vmem:[#allocation8 + $0x28] sm:$0xff]  }
  0x51   :  { %v1323_v23 = vld [vmem:[#allocation8 + $0x30] sm:$0xff]   ;;  %v973_v24 = vld [vmem:[%s1590_s2] ss:$0 sm:$0xff] }
  0x53   :  { %1163 = vmatpush3.bf16.msra.mxu0 %v1295_v2 }
  0x54   :  { %1164 = vmatprep.subr.bf16.mxu0 %v1296_v3 }
  0x57   :  { %1165 = vmatpush3.bf16.msra.mxu0 %v1296_v3 }
  0x58   :  { %1166 = vmatprep.subr.bf16.mxu0 %v1297_v5 }
  0x5b   :  { %1167 = vmatpush3.bf16.msra.mxu0 %v1297_v5 }
  0x5c   :  { %1168 = vmatprep.subr.bf16.mxu0 %v1298_v6 }
  0x5f   :  { %1169 = vmatpush3.bf16.msra.mxu0 %v1298_v6 }
  0x60   :  { %1170 = vmatprep.subr.bf16.mxu0 %v1299_v7 }
  0x63   :  { %1171 = vmatpush3.bf16.msra.mxu0 %v1299_v7 }
  0x64   :  { %1172 = vmatprep.subr.bf16.mxu0 %v1300_v8 }
  0x67   :  { %1173 = vmatpush3.bf16.msra.mxu0 %v1300_v8 }
  0x68   :  { %1222 = vmatprep.subr.bf16.mxu0 %v1317_v17 }
  0x6a   :  { %1175 = vmatmul.mubr.bf16.vlgmr.msra.gmra.mrb[0].mxu0 %v1302_v9 }
  0x6b   :  { %1178 = vmatprep.mubr.bf16.mxu0 %v1303_v10  ;;  %1223 = vmatpush3.bf16.msra.mxu0 %v1317_v17  ;;  %v1310_v17 = vld [vmem:[#allocation3 + $0x8] sm:$0xff]  }
  0x6c   :  { %1224 = vmatprep.subr.bf16.mxu0 %v1318_v18 }
  0x6f   :  { %1225 = vmatpush3.bf16.msra.mxu0 %v1318_v18  ;;  %v1311_v18 = vld [vmem:[#allocation3 + $0x10] sm:$0xff]  }
  0x70   :  { %1226 = vmatprep.subr.bf16.mxu0 %v1319_v19 }
  0x72   :  { %1179 = vmatmul.mubr.bf16.gmra.mrb[4].mxu0 %v1304_v11 }
  0x73   :  { %1182 = vmatprep.mubr.bf16.mxu0 %v1305_v12  ;;  %1227 = vmatpush3.bf16.msra.mxu0 %v1319_v19  ;;  %v1312_v19 = vld [vmem:[#allocation3 + $0x18] sm:$0xff]  }
  0x74   :  { %1228 = vmatprep.subr.bf16.mxu0 %v1320_v20 }
  0x77   :  { %1229 = vmatpush3.bf16.msra.mxu0 %v1320_v20  ;;  %v1313_v20 = vld [vmem:[#allocation3 + $0x20] sm:$0xff]  }
  0x78   :  { %1230 = vmatprep.subr.bf16.mxu0 %v1321_v21 }
  0x7a   :  { %1183 = vmatmul.mubr.bf16.gmra.mrb[8].mxu0 %v1306_v13 }
  0x7b   :  { %1186 = vmatprep.mubr.bf16.mxu0 %v1307_v14  ;;  %1231 = vmatpush3.bf16.msra.mxu0 %v1321_v21  ;;  %v1314_v21 = vld [vmem:[#allocation3 + $0x28] sm:$0xff]  }
  0x7c   :  { %1232 = vmatprep.subr.bf16.mxu0 %v1322_v22 }
  0x7f   :  { %1233 = vmatpush3.bf16.msra.mxu0 %v1322_v22  ;;  %v1315_v22 = vld [vmem:[#allocation3 + $0x30] sm:$0xff]  }
  0x80   :  { %1234 = vmatprep.subr.bf16.mxu0 %v1323_v23 }
  0x82   :  { %1187 = vmatmul.mubr.bf16.gmra.mrb[12].mxu0 %v1308_v15 }
  0x83   :  { %1235 = vmatpush3.bf16.msra.mxu0 %v1323_v23  ;;  %v1316_v23 = vld [vmem:[#allocation3 + $0x38] sm:$0xff]  }
 0x13d   :  { %v1176_v25 = vpop.f32.mrb[0].mxu0 }
 0x13e   :  { %v258_v26 = vadd.f32 %v1176_v25, %v973_v24  ;;  %v249_v27 = vpop.f32.mrb[1].mxu0  ;;  %v1325_v25 = vld [vmem:[#allocation9] sm:$0xff]  }
 0x13f   :  { %v250_v28 = vadd.f32 %v973_v24, %v249_v27  ;;  %v1177_v29 = vpop.f32.mrb[2].mxu0  ;;  %v1327_v27 = vld [vmem:[#allocation9 + $0x10] sm:$0xff]  }
 0x140   :  { %v261_v30 = vadd.f32 %v1177_v29, %v973_v24  ;;  %v252_v31 = vpop.f32.mrb[3].mxu0  ;;  %v314_v33 = vmax.f32 %v258_v26, 0.0  ;;  %v1326_v26 = vld [vmem:[#allocation9 + $0x8] sm:$0xff]   ;;  %v1329_v29 = vld [vmem:[#allocation9 + $0x20] sm:$0xff]  }
 0x141   :  { %v253_v32 = vadd.f32 %v973_v24, %v252_v31  ;;  %v312_v35 = vmax.f32 %v250_v28, 0.0  ;;  %v1328_v28 = vld [vmem:[#allocation9 + $0x18] sm:$0xff]  }
 0x142   :  { %v315_v34 = vmax.f32 %v261_v30, 0.0  ;;  %v1330_v30 = vld [vmem:[#allocation9 + $0x28] sm:$0xff]  }
 0x143   :  { %v313_v36 = vmax.f32 %v253_v32, 0.0 }
 0x144   :  { %v329_v37 = vpack.c.bf16 %v315_v34, %v314_v33 }
 0x145   :  { %v1180_v38 = vpop.f32.mrb[4].mxu0  ;;  %v328_v39 = vpack.c.bf16 %v313_v36, %v312_v35 }
 0x146   :  { %v274_v40 = vadd.f32 %v1180_v38, %v973_v24  ;;  %v265_v41 = vpop.f32.mrb[5].mxu0 }
 0x147   :  { %v266_v42 = vadd.f32 %v973_v24, %v265_v41  ;;  %v1181_v43 = vpop.f32.mrb[6].mxu0  ;;  %1190 = vmatprep.subr.bf16.mxu1 %v328_v39 }
 0x148   :  { %v277_v44 = vadd.f32 %v1181_v43, %v973_v24  ;;  %v268_v45 = vpop.f32.mrb[7].mxu0  ;;  %1191 = vmatpush3.bf16.msra.mxu1 %v328_v39  ;;  %v318_v47 = vmax.f32 %v274_v40, 0.0 }
 0x149   :  { %v269_v46 = vadd.f32 %v973_v24, %v268_v45  ;;  %1192 = vmatprep.subr.bf16.mxu1 %v329_v37  ;;  %v316_v49 = vmax.f32 %v266_v42, 0.0 }
 0x14a   :  { %v319_v48 = vmax.f32 %v277_v44, 0.0 }
 0x14b   :  { %v317_v50 = vmax.f32 %v269_v46, 0.0 }
 0x14c   :  { %v331_v51 = vpack.c.bf16 %v319_v48, %v318_v47  ;;  %1193 = vmatpush3.bf16.msra.mxu1 %v329_v37 }
 0x14d   :  { %v330_v52 = vpack.c.bf16 %v317_v50, %v316_v49  ;;  %v1184_v53 = vpop.f32.mrb[8].mxu0 }
 0x14e   :  { %v290_v54 = vadd.f32 %v1184_v53, %v973_v24  ;;  %v281_v55 = vpop.f32.mrb[9].mxu0 }
 0x14f   :  { %v282_v56 = vadd.f32 %v973_v24, %v281_v55  ;;  %v1185_v57 = vpop.f32.mrb[10].mxu0  ;;  %1194 = vmatprep.subr.bf16.mxu1 %v330_v52  ;;  %v1331_v55 = vld [vmem:[#allocation9 + $0x30] sm:$0xff]  }
 0x150   :  { %v293_v58 = vadd.f32 %v1185_v57, %v973_v24  ;;  %v284_v59 = vpop.f32.mrb[11].mxu0  ;;  %1195 = vmatpush3.bf16.msra.mxu1 %v330_v52  ;;  %v322_v61 = vmax.f32 %v290_v54, 0.0  ;;  %v998_v57 = vld [vmem:[%s1592_s4] ss:$0 sm:$0xff]  ;;  %s1457_s4 = smov [#allocation11]  }
 0x151   :  { %v285_v60 = vadd.f32 %v973_v24, %v284_v59  ;;  %1196 = vmatprep.subr.bf16.mxu1 %v331_v51  ;;  %v320_v63 = vmax.f32 %v282_v56, 0.0  ;;  %v1332_v56 = vld [vmem:[#allocation9 + $0x38] sm:$0xff]   ;;  %s959_s23 = sshll.u32 %s1457_s4, 4  ;;  %s960_s23 = int_to_ptr.vmem [resolvable:$true] %s959_s23 }
 0x152   :  { %v323_v62 = vmax.f32 %v293_v58, 0.0  ;;  %s1421_s25 = scalar_lea.vmem %s960_s23, 1024  ;;  %p1426_p5 = scmp.lt.s32.totalorder %s960_s23, %s960_s23 }
 0x153   :  { %v321_v0 = vmax.f32 %v285_v60, 0.0  ;;  %p1422_p4 = scmp.ne.s32.totalorder %s960_s23, %s1421_s25  ;;  %p1427_p6 = scmp.lt.s32.totalorder %s1421_s25, %s1421_s25 }
 0x154   :  { %v333_v1 = vpack.c.bf16 %v323_v62, %v322_v61  ;;  %1197 = vmatpush3.bf16.msra.mxu1 %v331_v51 }
 0x155   :  { %v332_v2 = vpack.c.bf16 %v321_v0, %v320_v63  ;;  %v1188_v3 = vpop.f32.mrb[12].mxu0  ;;  %p1428_p7 = por %p1427_p6, %p1426_p5 }
 0x156   :  { %v306_v4 = vadd.f32 %v1188_v3, %v973_v24  ;;  %v297_v5 = vpop.f32.mrb[13].mxu0 }
 0x157   :  { %v298_v6 = vadd.f32 %v973_v24, %v297_v5  ;;  %v1189_v7 = vpop.f32.mrb[14].mxu0  ;;  %1198 = vmatprep.subr.bf16.mxu1 %v332_v2  ;;  %p1429_p8 = pnand %p1428_p7, %p1422_p4 }
 0x158   :  { %v309_v8 = vadd.f32 %v1189_v7, %v973_v24  ;;  %v300_v9 = vpop.f32.mrb[15].mxu0  ;;  %1199 = vmatpush3.bf16.msra.mxu1 %v332_v2  ;;  %v326_v11 = vmax.f32 %v306_v4, 0.0 }
 0x159   :  { %v301_v10 = vadd.f32 %v973_v24, %v300_v9  ;;  %1200 = vmatprep.subr.bf16.mxu1 %v333_v1  ;;  %v324_v13 = vmax.f32 %v298_v6, 0.0  ;;  %v1324_v24 = vld [vmem:[#allocation8 + $0x38] sm:$0xff]  }
 0x15a   :  { %v327_v12 = vmax.f32 %v309_v8, 0.0  ;;  %1236 = vmatprep.subr.bf16.mxu0 %v1324_v24 }
 0x15b   :  { %v325_v14 = vmax.f32 %v301_v10, 0.0  ;;  %1237 = vmatpush3.bf16.msra.mxu0 %v1324_v24 }
 0x15c   :  { %v335_v15 = vpack.c.bf16 %v327_v12, %v326_v11  ;;  %1201 = vmatpush3.bf16.msra.mxu1 %v333_v1 }
 0x15d   :  { %v334_v16 = vpack.c.bf16 %v325_v14, %v324_v13 }
 0x15f   :  { %1202 = vmatprep.subr.bf16.mxu1 %v334_v16 }
 0x160   :  { %1203 = vmatpush3.bf16.msra.mxu1 %v334_v16 }
 0x161   :  { %1204 = vmatprep.subr.bf16.mxu1 %v335_v15 }
 0x164   :  { %1205 = vmatpush3.bf16.msra.mxu1 %v335_v15 }
 0x165   :  { %1254 = vmatprep.subr.bf16.mxu1 %v1325_v25 }
 0x167   :  { %1207 = vmatmul.mubr.bf16.vlgmr.msra.gmra.mrb[0].mxu1 %v1310_v17 }
 0x168   :  { %1210 = vmatprep.mubr.bf16.mxu1 %v1311_v18  ;;  %1255 = vmatpush3.bf16.msra.mxu1 %v1325_v25 }
 0x169   :  { %1256 = vmatprep.subr.bf16.mxu1 %v1326_v26 }
 0x16c   :  { %1257 = vmatpush3.bf16.msra.mxu1 %v1326_v26 }
 0x16d   :  { %1258 = vmatprep.subr.bf16.mxu1 %v1327_v27 }
 0x16f   :  { %1211 = vmatmul.mubr.bf16.gmra.mrb[4].mxu1 %v1312_v19 }
 0x170   :  { %1214 = vmatprep.mubr.bf16.mxu1 %v1313_v20  ;;  %1259 = vmatpush3.bf16.msra.mxu1 %v1327_v27 }
 0x171   :  { %1260 = vmatprep.subr.bf16.mxu1 %v1328_v28 }
 0x174   :  { %1261 = vmatpush3.bf16.msra.mxu1 %v1328_v28 }
 0x175   :  { %1262 = vmatprep.subr.bf16.mxu1 %v1329_v29 }
 0x177   :  { %1215 = vmatmul.mubr.bf16.gmra.mrb[8].mxu1 %v1314_v21 }
 0x178   :  { %1218 = vmatprep.mubr.bf16.mxu1 %v1315_v22  ;;  %1263 = vmatpush3.bf16.msra.mxu1 %v1329_v29 }
 0x179   :  { %1264 = vmatprep.subr.bf16.mxu1 %v1330_v30 }
 0x17c   :  { %1265 = vmatpush3.bf16.msra.mxu1 %v1330_v30 }
 0x17d   :  { %1266 = vmatprep.subr.bf16.mxu1 %v1331_v55 }
 0x17f   :  { %1219 = vmatmul.mubr.bf16.gmra.mrb[12].mxu1 %v1316_v23 }
 0x180   :  { %1267 = vmatpush3.bf16.msra.mxu1 %v1331_v55 }
 0x181   :  { %1268 = vmatprep.subr.bf16.mxu1 %v1332_v56 }
 0x184   :  { %1269 = vmatpush3.bf16.msra.mxu1 %v1332_v56 }
 0x23a   :  { %v1208_v31 = vpop.f32.mrb[0].mxu1 }
 0x23b   :  { %v450_v32 = vpop.f32.mrb[1].mxu1 }
 0x23c   :  { %v1209_v33 = vpop.f32.mrb[2].mxu1 }
 0x23d   :  { %v514_v34 = vpack.c.bf16 %v1209_v33, %v1208_v31  ;;  %v453_v35 = vpop.f32.mrb[3].mxu1 }
 0x23e   :  { %v513_v36 = vpack.c.bf16 %v453_v35, %v450_v32 }
 0x240   :  { %1238 = vmatprep.mubr.bf16.mxu0 %v513_v36 }
 0x241   :  { %1239 = vmatmul.mubr.bf16.vlgmr.msra.gmra.mrb[16].mxu0 %v514_v34 }
 0x242   :  { %v1212_v37 = vpop.f32.mrb[4].mxu1 }
 0x243   :  { %v466_v38 = vpop.f32.mrb[5].mxu1 }
 0x244   :  { %v1213_v39 = vpop.f32.mrb[6].mxu1 }
 0x245   :  { %v516_v40 = vpack.c.bf16 %v1213_v39, %v1212_v37  ;;  %v469_v41 = vpop.f32.mrb[7].mxu1 }
 0x246   :  { %v515_v42 = vpack.c.bf16 %v469_v41, %v466_v38 }
 0x248   :  { %1242 = vmatprep.mubr.bf16.mxu0 %v515_v42 }
 0x249   :  { %1243 = vmatmul.mubr.bf16.gmra.mrb[20].mxu0 %v516_v40 }
 0x24a   :  { %v1216_v43 = vpop.f32.mrb[8].mxu1 }
 0x24b   :  { %v482_v44 = vpop.f32.mrb[9].mxu1 }
 0x24c   :  { %v1217_v45 = vpop.f32.mrb[10].mxu1 }
 0x24d   :  { %v518_v46 = vpack.c.bf16 %v1217_v45, %v1216_v43  ;;  %v485_v47 = vpop.f32.mrb[11].mxu1 }
 0x24e   :  { %v517_v48 = vpack.c.bf16 %v485_v47, %v482_v44 }
 0x250   :  { %1246 = vmatprep.mubr.bf16.mxu0 %v517_v48 }
 0x251   :  { %1247 = vmatmul.mubr.bf16.gmra.mrb[24].mxu0 %v518_v46 }
 0x252   :  { %v1220_v49 = vpop.f32.mrb[12].mxu1 }
 0x253   :  { %v498_v50 = vpop.f32.mrb[13].mxu1 }
 0x254   :  { %v1221_v51 = vpop.f32.mrb[14].mxu1 }
 0x255   :  { %v520_v52 = vpack.c.bf16 %v1221_v51, %v1220_v49  ;;  %v501_v53 = vpop.f32.mrb[15].mxu1 }
 0x256   :  { %v519_v54 = vpack.c.bf16 %v501_v53, %v498_v50 }
 0x258   :  { %1250 = vmatprep.mubr.bf16.mxu0 %v519_v54 }
 0x259   :  { %1251 = vmatmul.mubr.bf16.gmra.mrb[28].mxu0 %v520_v52 }
 0x314   :  { %v1240_v58 = vpop.f32.mrb[16].mxu0 }
 0x315   :  { %v635_v59 = vadd.f32 %v1240_v58, %v998_v57  ;;  %v626_v60 = vpop.f32.mrb[17].mxu0 }
 0x316   :  { %v627_v61 = vadd.f32 %v998_v57, %v626_v60  ;;  %v1241_v62 = vpop.f32.mrb[18].mxu0 }
 0x317   :  { %v638_v63 = vadd.f32 %v1241_v62, %v998_v57  ;;  %v629_v0 = vpop.f32.mrb[19].mxu0  ;;  %v691_v2 = vmax.f32 %v635_v59, 0.0 }
 0x318   :  { %v630_v1 = vadd.f32 %v998_v57, %v629_v0  ;;  %v689_v4 = vmax.f32 %v627_v61, 0.0 }
 0x319   :  { %v692_v3 = vmax.f32 %v638_v63, 0.0 }
 0x31a   :  { %v690_v5 = vmax.f32 %v630_v1, 0.0 }
 0x31b   :  { %v706_v6 = vpack.c.bf16 %v692_v3, %v691_v2 }
 0x31c   :  { %v705_v7 = vpack.c.bf16 %v690_v5, %v689_v4  ;;  %v1244_v8 = vpop.f32.mrb[20].mxu0 }
 0x31d   :  { %v651_v9 = vadd.f32 %v1244_v8, %v998_v57  ;;  %v642_v10 = vpop.f32.mrb[21].mxu0 }
 0x31e   :  { %v643_v11 = vadd.f32 %v998_v57, %v642_v10  ;;  %v1245_v12 = vpop.f32.mrb[22].mxu0  ;;  %1270 = vmatprep.mubr.bf16.mxu1 %v705_v7 }
 0x31f   :  { %v654_v13 = vadd.f32 %v1245_v12, %v998_v57  ;;  %v645_v14 = vpop.f32.mrb[23].mxu0  ;;  %1271 = vmatmul.mubr.bf16.vlgmr.msra.gmra.mrb[16].mxu1 %v706_v6  ;;  %v695_v16 = vmax.f32 %v651_v9, 0.0 }
 0x320   :  { %v646_v15 = vadd.f32 %v998_v57, %v645_v14  ;;  %v693_v18 = vmax.f32 %v643_v11, 0.0 }
 0x321   :  { %v696_v17 = vmax.f32 %v654_v13, 0.0 }
 0x322   :  { %v694_v19 = vmax.f32 %v646_v15, 0.0 }
 0x323   :  { %v708_v20 = vpack.c.bf16 %v696_v17, %v695_v16 }
 0x324   :  { %v707_v21 = vpack.c.bf16 %v694_v19, %v693_v18  ;;  %v1248_v22 = vpop.f32.mrb[24].mxu0 }
 0x325   :  { %v667_v23 = vadd.f32 %v1248_v22, %v998_v57  ;;  %v658_v24 = vpop.f32.mrb[25].mxu0 }
 0x326   :  { %v659_v25 = vadd.f32 %v998_v57, %v658_v24  ;;  %v1249_v26 = vpop.f32.mrb[26].mxu0  ;;  %1274 = vmatprep.mubr.bf16.mxu1 %v707_v21 }
 0x327   :  { %v670_v27 = vadd.f32 %v1249_v26, %v998_v57  ;;  %v661_v28 = vpop.f32.mrb[27].mxu0  ;;  %1275 = vmatmul.mubr.bf16.gmra.mrb[20].mxu1 %v708_v20  ;;  %v699_v30 = vmax.f32 %v667_v23, 0.0 }
 0x328   :  { %v662_v29 = vadd.f32 %v998_v57, %v661_v28  ;;  %v697_v32 = vmax.f32 %v659_v25, 0.0 }
 0x329   :  { %v700_v31 = vmax.f32 %v670_v27, 0.0 }
 0x32a   :  { %v698_v33 = vmax.f32 %v662_v29, 0.0 }
 0x32b   :  { %v710_v34 = vpack.c.bf16 %v700_v31, %v699_v30 }
 0x32c   :  { %v709_v35 = vpack.c.bf16 %v698_v33, %v697_v32  ;;  %v1252_v36 = vpop.f32.mrb[28].mxu0 }
 0x32d   :  { %v683_v37 = vadd.f32 %v1252_v36, %v998_v57  ;;  %v674_v38 = vpop.f32.mrb[29].mxu0 }
 0x32e   :  { %v675_v39 = vadd.f32 %v998_v57, %v674_v38  ;;  %v1253_v40 = vpop.f32.mrb[30].mxu0  ;;  %1278 = vmatprep.mubr.bf16.mxu1 %v709_v35 }
 0x32f   :  { %v686_v41 = vadd.f32 %v1253_v40, %v998_v57  ;;  %v677_v42 = vpop.f32.mrb[31].mxu0  ;;  %1279 = vmatmul.mubr.bf16.gmra.mrb[24].mxu1 %v710_v34  ;;  %v703_v44 = vmax.f32 %v683_v37, 0.0 }
 0x330   :  { %v678_v43 = vadd.f32 %v998_v57, %v677_v42  ;;  %v701_v46 = vmax.f32 %v675_v39, 0.0 }
 0x331   :  { %v704_v45 = vmax.f32 %v686_v41, 0.0 }
 0x332   :  { %v702_v47 = vmax.f32 %v678_v43, 0.0 }
 0x333   :  { %v712_v48 = vpack.c.bf16 %v704_v45, %v703_v44 }
 0x334   :  { %v711_v49 = vpack.c.bf16 %v702_v47, %v701_v46 }
 0x336   :  { %1282 = vmatprep.mubr.bf16.mxu1 %v711_v49 }
 0x337   :  { %1283 = vmatmul.mubr.bf16.gmra.mrb[28].mxu1 %v712_v48 }
 0x3f2   :  { %v1272_v50 = vpop.f32.mrb[16].mxu1 }
 0x3f3   :  { %v811_v51 = vpop.f32.mrb[17].mxu1 }
 0x3f4   :  { %v1273_v52 = vpop.f32.mrb[18].mxu1 }
 0x3f5   :  { %v1055_v53 = vpack.c.bf16 %v1273_v52, %v1272_v50  ;;  %v814_v54 = vpop.f32.mrb[19].mxu1 }
 0x3f6   :  { %v1050_v55 = vpack.c.bf16 %v814_v54, %v811_v51 }
 0x3f7   :  { %1087 = vst [vmem:[#allocation11 + $0x8] sm:$0xff] %v1055_v53  }
 0x3f8   :  { %1051 = vst [vmem:[#allocation11] sm:$0xff] %v1050_v55  }
 0x3fa   :  { %v1276_v56 = vpop.f32.mrb[20].mxu1 }
 0x3fb   :  { %v827_v58 = vpop.f32.mrb[21].mxu1 }
 0x3fc   :  { %v1277_v59 = vpop.f32.mrb[22].mxu1 }
 0x3fd   :  { %v1065_v57 = vpack.c.bf16 %v1277_v59, %v1276_v56  ;;  %v830_v60 = vpop.f32.mrb[23].mxu1 }
 0x3fe   :  { %v1060_v61 = vpack.c.bf16 %v830_v60, %v827_v58 }
 0x3ff   :  { %1089 = vst [vmem:[#allocation11 + $0x18] sm:$0xff] %v1065_v57  }
 0x400   :  { %1088 = vst [vmem:[#allocation11 + $0x10] sm:$0xff] %v1060_v61  }
 0x402   :  { %v1280_v62 = vpop.f32.mrb[24].mxu1 }
 0x403   :  { %v843_v63 = vpop.f32.mrb[25].mxu1 }
 0x404   :  { %v1281_v0 = vpop.f32.mrb[26].mxu1 }
 0x405   :  { %v1075_v1 = vpack.c.bf16 %v1281_v0, %v1280_v62  ;;  %v846_v2 = vpop.f32.mrb[27].mxu1 }
 0x406   :  { %v1070_v3 = vpack.c.bf16 %v846_v2, %v843_v63 }
 0x407   :  { %1091 = vst [vmem:[#allocation11 + $0x28] sm:$0xff] %v1075_v1  }
 0x408   :  { %1090 = vst [vmem:[#allocation11 + $0x20] sm:$0xff] %v1070_v3  }
 0x40a   :  { %v1284_v4 = vpop.f32.mrb[28].mxu1 }
 0x40b   :  { %v859_v5 = vpop.f32.mrb[29].mxu1 }
 0x40c   :  { %v1285_v6 = vpop.f32.mrb[30].mxu1 }
 0x40d   :  { %v1085_v7 = vpack.c.bf16 %v1285_v6, %v1284_v4  ;;  %v862_v8 = vpop.f32.mrb[31].mxu1 }
 0x40e   :  { %v1080_v9 = vpack.c.bf16 %v862_v8, %v859_v5 }
 0x40f   :  { %1093 = vst [vmem:[#allocation11 + $0x38] sm:$0xff] %v1085_v7  }
 0x410   :  { %1092 = vst [vmem:[#allocation11 + $0x30] sm:$0xff] %v1080_v9  }
 0x411   :  { %1432 = shalt.err (!%p1429_p8)
}
 0x412   :  { %s1433_s28 = scalar_lea.hbm %s1594_s6, 1024 }
 0x413   :  { %p1434_p9 = scmp.ne.s32.totalorder %s1594_s6, %s1433_s28  ;;  %p1437_p10 = scmp.lt.u32.totalorder %s1433_s28, %s1594_s6 }
 0x415   :  { %p1439_p11 = pnand %p1437_p10, %p1434_p9 }
 0x417   :  { %1442 = shalt.err (!%p1439_p11)
}
 0x418   :  { %965 = dma.vmem_to_hbm [thread:$0]  %s960_s23, 1024, %s1594_s6, [#allocation5], %s1453_s9, %s1453_s9, %s1454_s10  }
 0x419   :  { %1449 = dma.done.wait [#allocation5], 1024  }
 0x41a   :  { %1450 = vsyncadd [#allocation5], 4294966272 }
 0x41b   :  { %969 = vsyncpa [#allocation4], 1 }
 0x41c   :  { %970 = vsyncpa [#allocation7], 1 }
 0x41d   :  { %971 = vsyncpa [#allocation10], 1 }
 0x41e   :  { %972 = vsyncpa [#allocation5], 1 }

</bundles_post_ra>
